<compile_context>
chip_gen: v5e
topology: v5e:2x2
jax: 0.10.0
libtpu: 0.0.40
codegen_flags: <defaults>
</compile_context>

<pallas_src>
import jax
import jax.numpy as jnp
from jax.experimental import pallas as pl
from jax.experimental.pallas import tpu as pltpu


def _round8(n: int) -> int:
    return ((n + 7) // 8) * 8


# ---------------------------------------------------------------------------
# Fused kernel:
#   cond-bias  = b1_cat + sum_p folded_table_p[idx_p]          (gather + add)
#   Y = SiLU( SiLU( X @ W1_blockdiag + cond-bias ) @ W2_blockdiag + b2_cat )
# X is the block-diagonal (N+G, Dn+Dg) activation slab built in the wrapper.
# All parameters live in one packed (rows, PW) f32 buffer; segments are
# addressed with STATIC row offsets (zero-cost ref slices).
# ---------------------------------------------------------------------------
def _make_fused_kernel(d_in, h_out, layout, fold_layout):
    w1_r0 = layout["w1"]
    w2_r0 = layout["w2"]
    b1_r0 = layout["b1"]
    b2_r0 = layout["b2"]

    def kernel(idx_ref, x_ref, p_ref, y_ref):
        # --- static slices into the packed parameter buffer ----------------
        w1 = p_ref[w1_r0:w1_r0 + d_in, 0:h_out]      # (Din, H)  block-diag W1x
        w2 = p_ref[w2_r0:w2_r0 + h_out, 0:h_out]     # (H, H)    block-diag W2
        b2 = p_ref[b2_r0:b2_r0 + 1, 0:h_out]         # (1, H)

        # --- condition contribution: gather from host-folded tables --------
        cond = p_ref[b1_r0:b1_r0 + 1, 0:h_out]       # start from b1_cat
        for pidx, (f_r0, f_rows) in enumerate(fold_layout):
            tbl = p_ref[f_r0:f_r0 + f_rows, 0:h_out]             # (rows, H)
            row_ids = jax.lax.broadcasted_iota(jnp.int32, (f_rows, h_out), 0)
            # Tiny-table gather as a masked row-sum (free VPU filler under
            # the matmuls; padded rows are zero).
            cond = cond + jnp.sum(
                jnp.where(row_ids == idx_ref[pidx], tbl, 0.0),
                axis=0, keepdims=True)                            # (1, H)

        def silu(v):
            # Exact SiLU (holds the 1e-5 check).  approx=True would put the
            # reciprocal on the otherwise-idle EUP slot.
            return v * pl.reciprocal(1.0 + jnp.exp(-v), approx=False)

        # --- merged node+graph MLP (dropout p=0.0 == identity) -------------
        x = x_ref[...]                                            # (R, Din)
        a1 = silu(jnp.dot(x, w1, preferred_element_type=jnp.float32) + cond)
        y = silu(jnp.dot(a1, w2, preferred_element_type=jnp.float32) + b2)
        y_ref[...] = y.astype(y_ref.dtype)

    return kernel


def condition_embedding_fused(idx, x, params, *, d_in, h_out, layout,
                              fold_layout):
    """Single pallas_call computing the combined (N+G, Hn+Hg) output."""
    R = x.shape[0]

    flops = 2 * R * (d_in * h_out + h_out * h_out)
    transcendentals = 2 * R * h_out                 # one exp per SiLU element
    bytes_accessed = (int(x.size) + int(params.size) + R * h_out) * 4 \
        + int(idx.size) * 4

    grid_spec = pltpu.PrefetchScalarGridSpec(
        num_scalar_prefetch=1,
        grid=(1,),
        in_specs=[
            pl.BlockSpec(tuple(x.shape), lambda i, idx_ref: (0, 0)),
            pl.BlockSpec(tuple(params.shape), lambda i, idx_ref: (0, 0)),
        ],
        out_specs=pl.BlockSpec((R, h_out), lambda i, idx_ref: (0, 0)),
    )

    return pl.pallas_call(
        _make_fused_kernel(d_in, h_out, layout, fold_layout),
        out_shape=jax.ShapeDtypeStruct((R, h_out), x.dtype),
        grid_spec=grid_spec,
        compiler_params=pltpu.CompilerParams(
            dimension_semantics=("arbitrary",)),
        cost_estimate=pl.CostEstimate(flops=flops,
                                      transcendentals=transcendentals,
                                      bytes_accessed=bytes_accessed),
    )(idx, x, params)


# ---------------------------------------------------------------------------
# Parameter container / model wrapper (plain JAX glue + host-side packing)
# ---------------------------------------------------------------------------
class ConditionEmbeddingModel:
    def __init__(self, key, core_node_vector_dim, core_graph_vector_dim,
                 condition_dim):
        """condition_dim: dict key -> (num_embeddings, embedding_dim)."""
        self.node_dim = core_node_vector_dim
        self.graph_dim = core_graph_vector_dim
        self.property_keys = sorted(condition_dim.keys())
        self.emb_dims = [condition_dim[k][1] for k in self.property_keys]
        self.cond_dim = sum(self.emb_dims)

        n_emb = len(condition_dim)
        keys = jax.random.split(key, n_emb + 8)
        ki = iter(range(len(keys)))

        # nn.Embedding: weights ~ N(0, 1)
        self.embeddings = {}
        for k in self.property_keys:
            num, dim = condition_dim[k]
            self.embeddings[k] = jax.random.normal(
                keys[next(ki)], (num, dim), jnp.float32)

        def linear(k, fan_in, fan_out):
            bound = 1.0 / jnp.sqrt(fan_in)
            kw, kb = jax.random.split(k)
            w = jax.random.uniform(kw, (fan_in, fan_out), jnp.float32,
                                   -bound, bound)
            b = jax.random.uniform(kb, (1, fan_out), jnp.float32, -bound, bound)
            return w, b

        # node_mlp: Linear(node+cond, node) -> SiLU -> Linear(node, node) -> SiLU
        w1, self.node_b1 = linear(keys[next(ki)],
                                  core_node_vector_dim + self.cond_dim,
                                  core_node_vector_dim)
        self.node_w1x = w1[:core_node_vector_dim]
        self.node_w1c = w1[core_node_vector_dim:]
        self.node_w2, self.node_b2 = linear(keys[next(ki)],
                                            core_node_vector_dim,
                                            core_node_vector_dim)

        # graph_mlp: Linear(graph+cond, graph) -> SiLU -> Linear(graph, graph) -> SiLU
        w1g, self.graph_b1 = linear(keys[next(ki)],
                                    core_graph_vector_dim + self.cond_dim,
                                    core_graph_vector_dim)
        self.graph_w1x = w1g[:core_graph_vector_dim]
        self.graph_w1c = w1g[core_graph_vector_dim:]
        self.graph_w2, self.graph_b2 = linear(keys[next(ki)],
                                              core_graph_vector_dim,
                                              core_graph_vector_dim)

        # --------------- host-side packing for the fused kernel ------------
        Dn, Dg = core_node_vector_dim, core_graph_vector_dim
        Hn, Hg = core_node_vector_dim, core_graph_vector_dim
        self.d_in = Dn + Dg
        self.h_out = Hn + Hg

        def blockdiag(a, b):
            ra, ca = a.shape
            rb, cb = b.shape
            out = jnp.zeros((ra + rb, ca + cb), jnp.float32)
            out = out.at[:ra, :ca].set(a)
            out = out.at[ra:, ca:].set(b)
            return out

        w1_bd = blockdiag(self.node_w1x, self.graph_w1x)     # (Dn+Dg, Hn+Hg)
        w2_bd = blockdiag(self.node_w2, self.graph_w2)       # (Hn+Hg, Hn+Hg)
        b1_cat = jnp.concatenate([self.node_b1, self.graph_b1], axis=-1)
        b2_cat = jnp.concatenate([self.node_b2, self.graph_b2], axis=-1)

        # Fold each embedding table through its W1c slice (exact f32 host
        # precompute) -> gather+add only inside the kernel.
        hi = jax.lax.Precision.HIGHEST
        folded = []
        off = 0
        for k in self.property_keys:
            d = condition_dim[k][1]
            t = self.embeddings[k]
            fn = jnp.dot(t, self.node_w1c[off:off + d], precision=hi)
            fg = jnp.dot(t, self.graph_w1c[off:off + d], precision=hi)
            folded.append(jnp.concatenate([fn, fg], axis=-1))  # (num_k, Hn+Hg)
            off += d

        # Pack everything into one (rows, PW) f32 buffer, segments aligned to
        # multiples of 8 rows, common lane width PW.
        PW = max(self.d_in, self.h_out)
        segs = []
        cursor = 0
        self.layout = {}
        self.fold_layout = []

        def add_seg(arr):
            nonlocal cursor
            r = _round8(arr.shape[0])
            seg = jnp.zeros((r, PW), jnp.float32)
            seg = seg.at[:arr.shape[0], :arr.shape[1]].set(arr)
            segs.append(seg)
            start = cursor
            cursor += r
            return start, r

        self.layout["w1"], _ = add_seg(w1_bd)
        self.layout["w2"], _ = add_seg(w2_bd)
        self.layout["b1"], _ = add_seg(b1_cat)
        self.layout["b2"], _ = add_seg(b2_cat)
        for f in folded:
            self.fold_layout.append(add_seg(f))
        self.params_packed = jnp.concatenate(segs, axis=0)    # (rows, PW)

    # embedding_property (pure-JAX, used by the reference check)
    def embedding_property(self, condition):
        assert sorted(condition.keys()) == self.property_keys, "Invalid keys"
        vecs = [self.embeddings[k][condition[k]][None, :]
                for k in self.property_keys]
        return jnp.concatenate(vecs, axis=-1)  # (1, cond_dim)

    def forward(self, h_core, Z_core, condition, node2graph=None):
        assert sorted(condition.keys()) == self.property_keys, "Invalid keys"
        assert node2graph is None  # TODO(synk): node2graph gather path
        idx = jnp.asarray([condition[k] for k in self.property_keys],
                          dtype=jnp.int32)

        N = h_core.shape[0]
        G = Z_core.shape[0]
        Dn, Dg = self.node_dim, self.graph_dim
        Hn = self.node_dim

        # Block-diagonal activation slab (layout plumbing, not compute):
        # rows [0,N): h_core in cols [0,Dn); row [N,N+G): Z_core in cols [Dn,).
        x = jnp.zeros((N + G, Dn + Dg), jnp.float32)
        x = x.at[:N, :Dn].set(h_core.astype(jnp.float32))
        x = x.at[N:, Dn:].set(Z_core.astype(jnp.float32))

        y = condition_embedding_fused(
            idx, x, self.params_packed,
            d_in=self.d_in, h_out=self.h_out,
            layout=self.layout, fold_layout=self.fold_layout)

        h_out = y[:N, :Hn].astype(h_core.dtype)
        z_out = y[N:, Hn:].astype(Z_core.dtype)
        return h_out, z_out


# ---------------------------------------------------------------------------
# Pure-JAX reference (for correctness check)
# ---------------------------------------------------------------------------
def _silu(x):
    return x * jax.nn.sigmoid(x)


def _ref_mlp(x, cond, w1x, w1c, b1, w2, b2):
    cond_rep = jnp.tile(cond, (x.shape[0], 1))
    xin = jnp.concatenate([x, cond_rep], axis=-1)
    w1 = jnp.concatenate([w1x, w1c], axis=0)
    a1 = _silu(xin @ w1 + b1)
    return _silu(a1 @ w2 + b2)


if __name__ == "__main__":
    key = jax.random.PRNGKey(0)
    k_model, k_h, k_z = jax.random.split(key, 3)

    core_node_vector_dim = 32
    core_graph_vector_dim = 32
    condition_dim = {"temperature": (10, 8), "pressure": (12, 8)}  # cond_dim=16
    num_nodes = 8

    model = ConditionEmbeddingModel(k_model, core_node_vector_dim,
                                    core_graph_vector_dim, condition_dim)

    h_core = jax.random.normal(k_h, (num_nodes, core_node_vector_dim),
                               jnp.float32)
    Z_core = jax.random.normal(k_z, (1, core_graph_vector_dim), jnp.float32)
    condition = {"temperature": 3, "pressure": 7}

    h_out, z_out = model.forward(h_core, Z_core, condition)
    jax.block_until_ready((h_out, z_out))

    # correctness check against pure-JAX reference
    z_cond = model.embedding_property(condition)
    h_ref = _ref_mlp(h_core, z_cond, model.node_w1x, model.node_w1c,
                     model.node_b1, model.node_w2, model.node_b2)
    z_ref = _ref_mlp(Z_core, z_cond, model.graph_w1x, model.graph_w1c,
                     model.graph_b1, model.graph_w2, model.graph_b2)

    assert h_out.shape == (num_nodes, core_node_vector_dim)
    assert z_out.shape == (1, core_graph_vector_dim)
    assert jnp.allclose(h_out, h_ref, atol=1e-5, rtol=1e-5)
    assert jnp.allclose(z_out, z_ref, atol=1e-5, rtol=1e-5)

    print("KERNEL_OK")
</pallas_src>

<mosaic_0001>
module attributes {stable_mosaic.version = 11 : i64} {
  func.func @kernel(%arg0: i32, %arg1: memref<2xi32, #tpu.memory_space<smem>>, %arg2: memref<9x64xf32, #tpu.memory_space<vmem>>, %arg3: memref<176x64xf32, #tpu.memory_space<vmem>>, %arg4: memref<9x64xf32, #tpu.memory_space<vmem>>) attributes {dimension_semantics = [#tpu.dimension_semantics<arbitrary>], iteration_bounds = array<i64: 1>, scalar_prefetch = 1 : i64, scratch_operands = 0 : i64, tpu.core_type = #tpu.core_type<tc>, window_params = [{pipeline_mode = #tpu.pipeline_mode<synchronous>, transform_indices = @transform_0, window_bounds = array<i64: 9, 64>}, {pipeline_mode = #tpu.pipeline_mode<synchronous>, transform_indices = @transform_1, window_bounds = array<i64: 176, 64>}, {pipeline_mode = #tpu.pipeline_mode<synchronous>, transform_indices = @transform_2, window_bounds = array<i64: 9, 64>}]} {
    %c0 = arith.constant 0 : index
    %c0_0 = arith.constant 0 : index
    %0 = vector.load %arg3[%c0, %c0_0] : memref<176x64xf32, #tpu.memory_space<vmem>>, vector<64x64xf32>
    %c64 = arith.constant 64 : index
    %c0_1 = arith.constant 0 : index
    %1 = vector.load %arg3[%c64, %c0_1] : memref<176x64xf32, #tpu.memory_space<vmem>>, vector<64x64xf32>
    %c136 = arith.constant 136 : index
    %c0_2 = arith.constant 0 : index
    %2 = vector.load %arg3[%c136, %c0_2] : memref<176x64xf32, #tpu.memory_space<vmem>>, vector<1x64xf32>
    %c128 = arith.constant 128 : index
    %c0_3 = arith.constant 0 : index
    %3 = vector.load %arg3[%c128, %c0_3] : memref<176x64xf32, #tpu.memory_space<vmem>>, vector<1x64xf32>
    %c144 = arith.constant 144 : index
    %c0_4 = arith.constant 0 : index
    %4 = vector.load %arg3[%c144, %c0_4] : memref<176x64xf32, #tpu.memory_space<vmem>>, vector<16x64xf32>
    %5 = tpu.iota {dimensions = array<i32: 0>} : vector<16x64xi32>
    %c0_5 = arith.constant 0 : index
    %6 = memref.load %arg1[%c0_5] : memref<2xi32, #tpu.memory_space<smem>>
    %7 = vector.broadcast %6 : i32 to vector<16x64xi32>
    %8 = arith.cmpi eq, %5, %7 : vector<16x64xi32>
    %cst = arith.constant 0.000000e+00 : f32
    %9 = vector.broadcast %cst : f32 to vector<16x64xf32>
    %10 = arith.select %8, %4, %9 : vector<16x64xi1>, vector<16x64xf32>
    %cst_6 = arith.constant dense<0.000000e+00> : vector<64xf32>
    %11 = vector.multi_reduction <add>, %10, %cst_6 [0] : vector<16x64xf32> to vector<64xf32>
    %12 = vector.shape_cast %11 : vector<64xf32> to vector<1x64xf32>
    %13 = arith.addf %3, %12 : vector<1x64xf32>
    %c160 = arith.constant 160 : index
    %c0_7 = arith.constant 0 : index
    %14 = vector.load %arg3[%c160, %c0_7] : memref<176x64xf32, #tpu.memory_space<vmem>>, vector<16x64xf32>
    %15 = tpu.iota {dimensions = array<i32: 0>} : vector<16x64xi32>
    %c1 = arith.constant 1 : index
    %16 = memref.load %arg1[%c1] : memref<2xi32, #tpu.memory_space<smem>>
    %17 = vector.broadcast %16 : i32 to vector<16x64xi32>
    %18 = arith.cmpi eq, %15, %17 : vector<16x64xi32>
    %cst_8 = arith.constant 0.000000e+00 : f32
    %19 = vector.broadcast %cst_8 : f32 to vector<16x64xf32>
    %20 = arith.select %18, %14, %19 : vector<16x64xi1>, vector<16x64xf32>
    %cst_9 = arith.constant dense<0.000000e+00> : vector<64xf32>
    %21 = vector.multi_reduction <add>, %20, %cst_9 [0] : vector<16x64xf32> to vector<64xf32>
    %22 = vector.shape_cast %21 : vector<64xf32> to vector<1x64xf32>
    %23 = arith.addf %13, %22 : vector<1x64xf32>
    %c0_10 = arith.constant 0 : index
    %c0_11 = arith.constant 0 : index
    %24 = vector.load %arg2[%c0_10, %c0_11] : memref<9x64xf32, #tpu.memory_space<vmem>>, vector<9x64xf32>
    %cst_12 = arith.constant dense<0.000000e+00> : vector<9x64xf32>
    %25 = tpu.matmul %24, %0, %cst_12 {dimension_numbers = #tpu.dot_dimension_numbers<[1], [0], [0], [1], [0, 0, 1, 1], [], []>} : vector<9x64xf32>, vector<64x64xf32>, vector<9x64xf32> -> vector<9x64xf32>
    %26 = vector.broadcast %23 : vector<1x64xf32> to vector<9x64xf32>
    %27 = arith.addf %25, %26 : vector<9x64xf32>
    %cst_13 = arith.constant 0.000000e+00 : f32
    %28 = vector.broadcast %cst_13 : f32 to vector<9x64xf32>
    %29 = arith.subf %28, %27 : vector<9x64xf32>
    %30 = math.exp %29 : vector<9x64xf32>
    %cst_14 = arith.constant 1.000000e+00 : f32
    %31 = vector.broadcast %cst_14 : f32 to vector<9x64xf32>
    %32 = arith.addf %31, %30 : vector<9x64xf32>
    %33 = tpu.reciprocal %32 : vector<9x64xf32> -> vector<9x64xf32>
    %34 = arith.mulf %27, %33 : vector<9x64xf32>
    %cst_15 = arith.constant dense<0.000000e+00> : vector<9x64xf32>
    %35 = tpu.matmul %34, %1, %cst_15 {dimension_numbers = #tpu.dot_dimension_numbers<[1], [0], [0], [1], [0, 0, 1, 1], [], []>} : vector<9x64xf32>, vector<64x64xf32>, vector<9x64xf32> -> vector<9x64xf32>
    %36 = vector.broadcast %2 : vector<1x64xf32> to vector<9x64xf32>
    %37 = arith.addf %35, %36 : vector<9x64xf32>
    %cst_16 = arith.constant 0.000000e+00 : f32
    %38 = vector.broadcast %cst_16 : f32 to vector<9x64xf32>
    %39 = arith.subf %38, %37 : vector<9x64xf32>
    %40 = math.exp %39 : vector<9x64xf32>
    %cst_17 = arith.constant 1.000000e+00 : f32
    %41 = vector.broadcast %cst_17 : f32 to vector<9x64xf32>
    %42 = arith.addf %41, %40 : vector<9x64xf32>
    %43 = tpu.reciprocal %42 : vector<9x64xf32> -> vector<9x64xf32>
    %44 = arith.mulf %37, %43 : vector<9x64xf32>
    %c0_18 = arith.constant 0 : index
    %c0_19 = arith.constant 0 : index
    %45 = vector.load %arg4[%c0_18, %c0_19] : memref<9x64xf32, #tpu.memory_space<vmem>>, vector<9x64xf32>
    tpu.vector_store %arg4[%c0_18, %c0_19], %44 {strides = array<i32>} : memref<9x64xf32, #tpu.memory_space<vmem>>, vector<9x64xf32>,
    return
  }
  func.func @transform_0(%arg0: i32, %arg1: memref<2xi32, #tpu.memory_space<smem>>) -> (i32, i32) {
    %c0_i32 = arith.constant 0 : i32
    %c0_i32_0 = arith.constant 0 : i32
    %c0_i32_1 = arith.constant 0 : i32
    return %c0_i32, %c0_i32_0 : i32, i32
  }
  func.func @transform_1(%arg0: i32, %arg1: memref<2xi32, #tpu.memory_space<smem>>) -> (i32, i32) {
    %c0_i32 = arith.constant 0 : i32
    %c0_i32_0 = arith.constant 0 : i32
    %c0_i32_1 = arith.constant 0 : i32
    return %c0_i32, %c0_i32_0 : i32, i32
  }
  func.func @transform_2(%arg0: i32, %arg1: memref<2xi32, #tpu.memory_space<smem>>) -> (i32, i32) {
    %c0_i32 = arith.constant 0 : i32
    %c0_i32_0 = arith.constant 0 : i32
    %c0_i32_1 = arith.constant 0 : i32
    return %c0_i32, %c0_i32_0 : i32, i32
  }
}

</mosaic_0001>

<bundles_post_ra>
// kernel: tpu_custom_call.1
= control target key start
LH: loop header
LB: loop body
LE: loop exit
PB: predicated region body
PF: predicated region fallthrough
CT: control target
= control target key end

     0   :  { %s320_s15 = smov [#allocation3]   ;;  %s431_s0 = inlined_call_operand.vmem [shape: s32[2], index: 0, kind: input, shape index: {}]   ;;  %s432_s1 = inlined_call_operand.vmem [shape: f32[9,64], index: 1, kind: input, shape index: {}]   ;;  %s433_s2 = inlined_call_operand.vmem [shape: f32[176,64], index: 2, kind: input, shape index: {}]   ;;  %s434_s3 = inlined_call_operand.hbm [shape: f32[9,64], index: 3, kind: output, shape index: {}]  }
   0x1   :  { %s9_s14 = sshll.u32 %s431_s0, 4  ;;  %s10_s14 = int_to_ptr.vmem [resolvable:$true] %s9_s14 }
   0x2   :  { %12 = dma.vmem_to_smem %s10_s14, 16, %s320_s15, [#allocation2] }
   0x3   :  { %316 = dma.done.wait [#allocation2], 16 }
   0x4   :  { %317 = vsyncadd [#allocation2], 4294967280 }
   0x5   :  { %15 = sfence }
   0x6   :  { %v28_v0 = vld [vmem:[%s433_s2 + $0x38] sm:$0xff]  ;;  %v27_v1 = vld [vmem:[%s433_s2 + $0x30] sm:$0xff]  ;;  %v26_v2 = vld [vmem:[%s433_s2 + $0x28] sm:$0xff] }
   0x7   :  { %96 = vmatpush.msra.mxu0 %v28_v0  ;;  %243 = vmatpush.msra.mxu2 %v28_v0  ;;  %v25_v3 = vld [vmem:[%s433_s2 + $0x20] sm:$0xff] }
   0x9   :  { %97 = vmatpush.msra.mxu0 %v27_v1  ;;  %244 = vmatpush.msra.mxu2 %v27_v1 }
   0xb   :  { %98 = vmatpush.msra.mxu0 %v26_v2  ;;  %245 = vmatpush.msra.mxu2 %v26_v2 }
   0xc   :  { %16 = vsyncpa [#allocation5], 0  ;;  %v24_v4 = vld [vmem:[%s433_s2 + $0x18] sm:$0xff]  ;;  %v23_v5 = vld [vmem:[%s433_s2 + $0x10] sm:$0xff]  ;;  %vm50_vm0 = vcmask 523264   ;;  %v41_v10 = vlaneseq  ;;  %s44_s8 = sld [smem:[#allocation3]] }
   0xd   :  { %99 = vmatpush.msra.mxu0 %v25_v3  ;;  %246 = vmatpush.msra.mxu2 %v25_v3  ;;  %v22_v6 = vld [vmem:[%s433_s2 + $0x8] sm:$0xff]  ;;  %v21_v7 = vld [vmem:[%s433_s2] sm:$0xff]  ;;  %s238_s9 = sld [smem:[#allocation3 + $0x1]]  ;;  %v39_v14 = vld [vmem:[%s433_s2 + $0x90] sm:$0xff]  ;;  %s226_s12 = sshll.u32 %s434_s3, 4  ;;  %s227_s12 = int_to_ptr.hbm [resolvable:$true] %s226_s12 }
   0xe   :  { %v79_v8 = vld [vmem:[%s432_s1] sm:$0xff]  ;;  %v80_v9 = vld [vmem:[%s432_s1 + $0x8] sm:$0x1]  ;;  %v42_v11 = vshrl.u32 %v41_v10, 7  ;;  %v40_v15 = vld [vmem:[%s433_s2 + $0x98] sm:$0xff]  ;;  %s322_s13 = smov 128  }
   0xf   :  { %100 = vmatpush.msra.mxu0 %v24_v4  ;;  %247 = vmatpush.msra.mxu2 %v24_v4  ;;  %v61_v19 = vld [vmem:[%s433_s2 + $0xa0] sm:$0xff]  ;;  %v62_v20 = vld [vmem:[%s433_s2 + $0xa8] sm:$0xff]  ;;  %v36_v41 = vld [vmem:[%s433_s2 + $0x78] sm:$0xff]  ;;  %s323_s1 = smov 8  }
  0x10   :  { %v43_v12 = vadd.s32 8, %v42_v11  ;;  %v38_v40 = vld [vmem:[%s433_s2 + $0x80] sm:$0x1]  ;;  %164 = vmatpush.msra.mxu1 %v36_v41  ;;  %251 = vmatpush.msra.mxu3 %v36_v41  ;;  %v35_v44 = vld [vmem:[%s433_s2 + $0x70] sm:$0xff]  ;;  %v34_v45 = vld [vmem:[%s433_s2 + $0x68] sm:$0xff] }
  0x11   :  { %101 = vmatpush.msra.mxu0 %v23_v5  ;;  %248 = vmatpush.msra.mxu2 %v23_v5  ;;  %v33_v47 = vld [vmem:[%s433_s2 + $0x60] sm:$0xff]  ;;  %v32_v48 = vld [vmem:[%s433_s2 + $0x58] sm:$0xff]  ;;  %v31_v50 = vld [vmem:[%s433_s2 + $0x50] sm:$0xff] }
  0x12   :  { %v45_v13 = vstv %s44_s8  ;;  %165 = vmatpush.msra.mxu1 %v35_v44  ;;  %252 = vmatpush.msra.mxu3 %v35_v44  ;;  %v30_v51 = vld [vmem:[%s433_s2 + $0x48] sm:$0xff]  ;;  %v29_v54 = vld [vmem:[%s433_s2 + $0x40] sm:$0xff] }
  0x13   :  { %102 = vmatpush.msra.mxu0 %v22_v6  ;;  %249 = vmatpush.msra.mxu2 %v22_v6  ;;  %vm46_vm1 = vcmp.eq.s32.totalorder %v42_v11, %v45_v13  ;;  %vm47_vm2 = vcmp.eq.s32.totalorder %v43_v12, %v45_v13  ;;  %v64_v16 = vstv %s238_s9 }
  0x14   :  { %v48_v17 = vsel %vm46_vm1, %v39_v14, 0.0  ;;  %v49_v18 = vsel %vm47_vm2, %v40_v15, 0.0  ;;  %vm65_vm3 = vcmp.eq.s32.totalorder %v42_v11, %v64_v16  ;;  %vm66_vm4 = vcmp.eq.s32.totalorder %v43_v12, %v64_v16  ;;  %166 = vmatpush.msra.mxu1 %v34_v45  ;;  %253 = vmatpush.msra.mxu3 %v34_v45 }
  0x15   :  { %103 = vmatpush.msra.mxu0 %v21_v7  ;;  %250 = vmatpush.msra.mxu2 %v21_v7  ;;  %v51_v21 = vsel %vm50_vm0, %v48_v17, 0.0  ;;  %v52_v22 = vsel %vm50_vm0, %v49_v18, 0.0  ;;  %v67_v23 = vsel %vm65_vm3, %v61_v19, 0.0  ;;  %v68_v24 = vsel %vm66_vm4, %v62_v20, 0.0 }
  0x16   :  { %239 = vmatmul.msk.f32.vlgmr.msra.gmra.mxu0 %vm50_vm0, %v79_v8  ;;  %240 = vmatmul.msk.f32.vlgmr.msra.gmra.mxu2 %vm50_vm0, %v80_v9  ;;  %v53_v25 = vadd.f32 %v52_v22, %v51_v21  ;;  %v69_v26 = vsel %vm50_vm0, %v67_v23, 0.0  ;;  %v70_v27 = vsel %vm50_vm0, %v68_v24, 0.0  ;;  %v263_v23 = vld [vmem:[%s433_s2 + $0x88] ss:$0 sm:$0xff]  ;;  %s321_s2 = smov [#allocation4]  }
  0x17   :  { %v71_v29 = vadd.f32 %v70_v27, %v69_v26  ;;  %167 = vmatpush.msra.mxu1 %v33_v47  ;;  %254 = vmatpush.msra.mxu3 %v33_v47  ;;  %s224_s9 = sshll.u32 %s321_s2, 4  ;;  %s225_s9 = int_to_ptr.vmem [resolvable:$true] %s224_s9 }
  0x18   :  { %v54_v28 = vrot.slane %v53_v25, 4 }
  0x19   :  { %v72_v31 = vrot.slane %v71_v29, 4  ;;  %168 = vmatpush.msra.mxu1 %v32_v48  ;;  %255 = vmatpush.msra.mxu3 %v32_v48 }
  0x1a   :  { %v55_v30 = vadd.f32 %v54_v28, %v53_v25 }
  0x1b   :  { %v73_v33 = vadd.f32 %v72_v31, %v71_v29  ;;  %169 = vmatpush.msra.mxu1 %v31_v50  ;;  %256 = vmatpush.msra.mxu3 %v31_v50 }
  0x1c   :  { %v56_v32 = vrot.slane %v55_v30, 2 }
  0x1d   :  { %v74_v35 = vrot.slane %v73_v33, 2  ;;  %170 = vmatpush.msra.mxu1 %v30_v51  ;;  %257 = vmatpush.msra.mxu3 %v30_v51 }
  0x1e   :  { %v57_v34 = vadd.f32 %v56_v32, %v55_v30 }
  0x1f   :  { %v75_v37 = vadd.f32 %v74_v35, %v73_v33  ;;  %171 = vmatpush.msra.mxu1 %v29_v54  ;;  %258 = vmatpush.msra.mxu3 %v29_v54 }
  0x20   :  { %v58_v36 = vrot.slane %v57_v34, 1 }
  0x21   :  { %v76_v39 = vrot.slane %v75_v37, 1 }
  0x22   :  { %v59_v38 = vadd.f32 %v58_v36, %v57_v34 }
  0x23   :  { %v77_v43 = vadd.f32 %v76_v39, %v75_v37 }
  0x24   :  { %v60_v42 = vadd.f32 %v59_v38, %v38_v40 }
  0x26   :  { %v78_v46 = vadd.f32 %v77_v43, %v60_v42 }
  0x28   :  { %v81_v49 = vperm.slane %v78_v46, 0 }
  0x93   :  { %v105_v52 = vpop.f32.mrf.mxu0 }
  0x94   :  { %v106_v53 = vadd.f32 %v105_v52, %v81_v49 }
  0x96   :  { %v111_v55 = vsub.f32 0.0, %v106_v53 }
  0x98   :  { %v113_v56 = vmul.f32 1.442695, %v111_v55 }
  0x99   :  { %v108_v57 = vpop.f32.mrf.mxu2 }
  0x9a   :  { %264 = vpow2.f32 %v113_v56  ;;  %v109_v58 = vadd.f32 %v108_v57, %v81_v49 }
  0x9c   :  { %v112_v59 = vsub.f32 0.0, %v109_v58 }
  0x9e   :  { %v115_v60 = vmul.f32 1.442695, %v112_v59 }
  0xa0   :  { %v265_v61 = vpop.eup %264  ;;  %266 = vpow2.f32 %v115_v60 }
  0xa1   :  { %v117_v62 = vadd.f32 1.0, %v265_v61 }
  0xa3   :  { %268 = vrcp.f32 %v117_v62  ;;  %v130_v3 = vand.u32 2147483648, %v117_v62  ;;  %vm124_vm5 = vweird.f32 %v117_v62  ;;  %v128_v5 = vand.u32 2147483647, %v117_v62 }
  0xa5   :  { %v131_v8 = vor.u32 1.1754944e-38, %v130_v3  ;;  %vm129_vm8 = vcmp.eq.f32.partialorder %v128_v5, 8.507059e+37 }
  0xa6   :  { %v267_v63 = vpop.eup %266 }
  0xa7   :  { %v118_v0 = vadd.f32 1.0, %v267_v63 }
  0xa9   :  { %v269_v1 = vpop.eup %268  ;;  %270 = vrcp.f32 %v118_v0  ;;  %v144_v14 = vand.u32 2147483648, %v118_v0  ;;  %v142_v17 = vand.u32 2147483647, %v118_v0  ;;  %vm138_vm10 = vweird.f32 %v118_v0 }
  0xaa   :  { %v120_v2 = vmul.f32 %v269_v1, %v117_v62  ;;  %vm125_vm6 = vweird.f32 %v269_v1 }
  0xab   :  { %vm126_vm7 = vmor %vm124_vm5, %vm125_vm6  ;;  %v145_v19 = vor.u32 1.1754944e-38, %v144_v14  ;;  %vm143_vm12 = vcmp.eq.f32.partialorder %v142_v17, 8.507059e+37 }
  0xac   :  { %v121_v4 = vsub.f32 1.0, %v120_v2 }
  0xae   :  { %v122_v6 = vmul.f32 %v269_v1, %v121_v4 }
  0xaf   :  { %v271_v7 = vpop.eup %270 }
  0xb0   :  { %v123_v9 = vadd.f32 %v269_v1, %v122_v6  ;;  %v134_v10 = vmul.f32 %v271_v7, %v118_v0  ;;  %vm139_vm9 = vweird.f32 %v271_v7 }
  0xb1   :  { %vm140_vm11 = vmor %vm138_vm10, %vm139_vm9 }
  0xb2   :  { %v127_v11 = vsel %vm126_vm7, %v269_v1, %v123_v9  ;;  %v135_v12 = vsub.f32 1.0, %v134_v10 }
  0xb3   :  { %v132_v13 = vsel %vm129_vm8, %v131_v8, %v127_v11 }
  0xb4   :  { %v147_v15 = vmul.f32 %v132_v13, %v106_v53  ;;  %v136_v16 = vmul.f32 %v271_v7, %v135_v12 }
  0xb6   :  { %v137_v18 = vadd.f32 %v271_v7, %v136_v16  ;;  %241 = vmatmul.msk.f32.vlgmr.msra.gmra.mxu1 %vm50_vm0, %v147_v15 }
  0xb8   :  { %v141_v20 = vsel %vm140_vm11, %v271_v7, %v137_v18 }
  0xb9   :  { %v146_v21 = vsel %vm143_vm12, %v145_v19, %v141_v20 }
  0xba   :  { %v148_v22 = vmul.f32 %v146_v21, %v109_v58 }
  0xbc   :  { %242 = vmatmul.msk.f32.vlgmr.msra.gmra.mxu3 %vm50_vm0, %v148_v22 }
 0x133   :  { %v173_v24 = vpop.f32.mrf.mxu1 }
 0x134   :  { %v174_v25 = vadd.f32 %v263_v23, %v173_v24 }
 0x136   :  { %v179_v26 = vsub.f32 0.0, %v174_v25 }
 0x138   :  { %v181_v27 = vmul.f32 1.442695, %v179_v26 }
 0x13a   :  { %272 = vpow2.f32 %v181_v27 }
 0x13f   :  { %v176_v28 = vpop.f32.mrf.mxu3 }
 0x140   :  { %v273_v29 = vpop.eup %272  ;;  %v177_v30 = vadd.f32 %v263_v23, %v176_v28 }
 0x141   :  { %v185_v31 = vadd.f32 1.0, %v273_v29 }
 0x142   :  { %v180_v32 = vsub.f32 0.0, %v177_v30 }
 0x143   :  { %274 = vrcp.f32 %v185_v31  ;;  %v198_v38 = vand.u32 2147483648, %v185_v31  ;;  %v196_v41 = vand.u32 2147483647, %v185_v31  ;;  %vm192_vm14 = vweird.f32 %v185_v31 }
 0x144   :  { %v183_v33 = vmul.f32 1.442695, %v180_v32 }
 0x145   :  { %v199_v43 = vor.u32 1.1754944e-38, %v198_v38  ;;  %vm197_vm1 = vcmp.eq.f32.partialorder %v196_v41, 8.507059e+37 }
 0x146   :  { %276 = vpow2.f32 %v183_v33 }
 0x149   :  { %v275_v34 = vpop.eup %274 }
 0x14a   :  { %v188_v35 = vmul.f32 %v275_v34, %v185_v31  ;;  %vm193_vm13 = vweird.f32 %v275_v34 }
 0x14b   :  { %vm194_vm15 = vmor %vm192_vm14, %vm193_vm13 }
 0x14c   :  { %v277_v36 = vpop.eup %276  ;;  %v189_v37 = vsub.f32 1.0, %v188_v35 }
 0x14d   :  { %v186_v39 = vadd.f32 1.0, %v277_v36 }
 0x14e   :  { %v190_v40 = vmul.f32 %v275_v34, %v189_v37 }
 0x14f   :  { %278 = vrcp.f32 %v186_v39  ;;  %v212_v50 = vand.u32 2147483648, %v186_v39  ;;  %v210_v52 = vand.u32 2147483647, %v186_v39  ;;  %vm206_vm3 = vweird.f32 %v186_v39 }
 0x150   :  { %v191_v42 = vadd.f32 %v275_v34, %v190_v40 }
 0x151   :  { %v213_v54 = vor.u32 1.1754944e-38, %v212_v50  ;;  %vm211_vm5 = vcmp.eq.f32.partialorder %v210_v52, 8.507059e+37 }
 0x152   :  { %v195_v44 = vsel %vm194_vm15, %v275_v34, %v191_v42 }
 0x153   :  { %v200_v45 = vsel %vm197_vm1, %v199_v43, %v195_v44 }
 0x154   :  { %v215_v46 = vmul.f32 %v200_v45, %v174_v25 }
 0x155   :  { %v279_v47 = vpop.eup %278 }
 0x156   :  { %217 = vst.msk [vmem:[#allocation4] sm:$0xff] %vm50_vm0, %v215_v46  ;;  %v202_v48 = vmul.f32 %v279_v47, %v186_v39  ;;  %vm207_vm2 = vweird.f32 %v279_v47  ;;  %vm218_vm0 = vcmask 516096  }
 0x157   :  { %vm208_vm4 = vmor %vm206_vm3, %vm207_vm2 }
 0x158   :  { %v203_v49 = vsub.f32 1.0, %v202_v48 }
 0x15a   :  { %v204_v51 = vmul.f32 %v279_v47, %v203_v49 }
 0x15c   :  { %v205_v53 = vadd.f32 %v279_v47, %v204_v51 }
 0x15e   :  { %v209_v55 = vsel %vm208_vm4, %v279_v47, %v205_v53 }
 0x15f   :  { %v214_v56 = vsel %vm211_vm5, %v213_v54, %v209_v55 }
 0x160   :  { %v216_v57 = vmul.f32 %v214_v56, %v177_v30 }
 0x162   :  { %219 = vst.msk [vmem:[#allocation4 + $0x8] sm:$0x1] %vm218_vm0, %v216_v57 }
 0x163   :  { %232 = dma.vmem_to_hbm [thread:$0]  %s225_s9, 256, %s227_s12, [#allocation5], %s322_s13, %s322_s13, %s323_s1  }
 0x164   :  { %318 = dma.done.wait [#allocation5], 256  }
 0x165   :  { %319 = vsyncadd [#allocation5], 4294967040 }
 0x166   :  { %237 = vsyncpa [#allocation5], 1 }

</bundles_post_ra>
